<compile_context>
chip_gen: v7x
topology: tpu7x:2x2x1
jax: 0.10.0
libtpu: 0.0.40
codegen_flags: <defaults>
</compile_context>

<pallas_src>
import numpy as np
import jax
import jax.numpy as jnp
from jax.experimental import pallas as pl
from jax.experimental.pallas import tpu as pltpu


def make_kernel_np(k):
    """Deterministic reproduction of make_kernel() (numpy)."""
    k = np.asarray(k, dtype=np.float32)
    if k.ndim == 1:
        k = k[None, :] * k[:, None]
    k = k / k.sum()
    return k


def _round_up(a, b):
    return (a + b - 1) // b * b


def _pick_channel_tile(nc, per_channel_bytes, budget_bytes=8 << 20):
    """Pick the channel tile TC (lane axis) and the (possibly padded) channel count.

    TC must be a multiple of 128 (lane width) or equal the full channel count
    (BlockSpec last-dim rule).  Size it against a conservative VMEM budget so the
    auto-pipelined buffers fit comfortably on v5e/v6e (128 MiB) and v7x (64 MiB).
    """
    if nc % 128 == 0:
        tc = 128
        while nc % (tc * 2) == 0 and (tc * 2) * per_channel_bytes <= budget_bytes:
            tc *= 2
        return tc, nc
    if nc * per_channel_bytes <= budget_bytes:
        return nc, nc                      # single block covering all channels
    # Large, non-lane-aligned channel count: pad channels up to a multiple of 128.
    return 128, _round_up(nc, 128)
    # TODO(synk): very large spatial extents (H*W per channel that no longer fits
    # VMEM even at TC=128) would additionally need spatial (halo) tiling.


def _dec_slice(start, size, step):
    return pl.ds(start, size) if step == 1 else pl.ds(start, size, stride=step)


def _build_downsample_kernel(k1f, down, pad0, h, w, out_h, out_w, has_pad):
    """Kernel body: separable FIR + decimation on a channels-last (H, W, TC) block."""
    taps = [(t, float(v)) for t, v in enumerate(k1f) if float(v) != 0.0]

    def kernel(x_ref, o_ref, pad_scr, tmp_scr):
        # Fold the zero padding into the kernel: the scratch border only needs to
        # be zeroed once (grid step 0); the interior is overwritten every step.
        if has_pad:
            @pl.when(pl.program_id(0) == 0)
            def _():
                pad_scr[...] = jnp.zeros_like(pad_scr)
        pad_scr[pad0:pad0 + h, pad0:pad0 + w, :] = x_ref[...].astype(jnp.float32)

        # Pass 1: FIR + decimate along W (sublane axis), for all padded rows.
        acc_w = None
        for j, wgt in taps:
            win = pad_scr[:, _dec_slice(j, out_w, down), :]
            acc_w = wgt * win if acc_w is None else acc_w + wgt * win
        tmp_scr[...] = acc_w                      # (Hp, out_w, TC) fp32

        # Pass 2: FIR + decimate along H (leading axis).
        acc = None
        for i, wgt in taps:
            win = tmp_scr[_dec_slice(i, out_h, down), :, :]
            acc = wgt * win if acc is None else acc + wgt * win
        o_ref[...] = acc.astype(o_ref.dtype)

    return kernel


def downsample_pallas(x, kernel_taps=(1, 3, 3, 1), factor=2):
    """Pallas equivalent of Downsample(kernel=kernel_taps, factor=factor).forward(x).

    x: (N, C, H, W) float array.  Returns (N, C, out_h, out_w).
    """
    k1 = np.asarray(kernel_taps, dtype=np.float32)
    assert k1.ndim == 1, "Downsample is constructed with 1-D separable taps"
    kt = k1.shape[0]
    k1 = k1 / k1.sum()          # outer(k1,k1)/sum == outer(k1/sum, k1/sum)
    k1f = k1[::-1]              # true convolution = correlation with flipped taps

    p = kt - factor
    pad0, pad1 = (p + 1) // 2, p // 2

    n, c, h, w = x.shape
    nc = n * c

    # Negative pads (factor > kernel size) crop; positive pads are done in-kernel.
    crop0, crop1 = max(-pad0, 0), max(-pad1, 0)
    pad0e, pad1e = max(pad0, 0), max(pad1, 0)

    # Channels-last: (H, W, N*C) so channels sit on lanes.
    xt = jnp.transpose(x.reshape(nc, h, w), (1, 2, 0))
    if crop0 or crop1:
        xt = xt[crop0:h - crop1, crop0:w - crop1, :]
    hh, ww = int(xt.shape[0]), int(xt.shape[1])

    hp = hh + pad0e + pad1e
    wp = ww + pad0e + pad1e
    out_h = (hp - kt) // factor + 1
    out_w = (wp - kt) // factor + 1
    assert out_h > 0 and out_w > 0, "invalid kernel/factor combination"
    has_pad = (pad0e > 0) or (pad1e > 0)

    # Per-channel VMEM bytes per grid step: double-buffered in/out blocks + scratch.
    per_channel_bytes = 4 * (2 * (hh * ww + out_h * out_w) + hp * wp + hp * out_w)
    tc, nc_pad = _pick_channel_tile(nc, per_channel_bytes)
    if nc_pad > nc:
        xt = jnp.pad(xt, ((0, 0), (0, 0), (0, nc_pad - nc)))

    kernel = _build_downsample_kernel(k1f, factor, pad0e, hh, ww, out_h, out_w, has_pad)

    itemsize = x.dtype.itemsize
    flops = 2 * kt * nc_pad * (hp * out_w + out_h * out_w)
    bytes_accessed = nc * (h * w + out_h * out_w) * itemsize

    out_t = pl.pallas_call(
        kernel,
        out_shape=jax.ShapeDtypeStruct((out_h, out_w, nc_pad), x.dtype),
        grid=(nc_pad // tc,),
        in_specs=[pl.BlockSpec((hh, ww, tc), lambda i: (0, 0, i))],
        out_specs=pl.BlockSpec((out_h, out_w, tc), lambda i: (0, 0, i)),
        scratch_shapes=[
            pltpu.VMEM((hp, wp, tc), jnp.float32),      # zero-padded input slab
            pltpu.VMEM((hp, out_w, tc), jnp.float32),   # after the W pass
        ],
        compiler_params=pltpu.CompilerParams(dimension_semantics=("parallel",)),
        cost_estimate=pl.CostEstimate(flops=int(flops), transcendentals=0,
                                      bytes_accessed=int(bytes_accessed)),
    )(xt)

    out_t = out_t[:, :, :nc]
    return jnp.transpose(out_t, (2, 0, 1)).reshape(n, c, out_h, out_w)


def _downsample_reference(x, kernel_taps=(1, 3, 3, 1), factor=2):
    """Pure-JAX reference (non-separable, non-Pallas); assumes non-negative pads."""
    k2d = make_kernel_np(kernel_taps)
    kh, kw = k2d.shape
    p = kh - factor
    pad0, pad1 = (p + 1) // 2, p // 2
    n, c, h, w = x.shape
    xf = x.reshape(n * c, h, w).astype(jnp.float32)
    xf = jnp.pad(xf, ((0, 0), (pad0, pad1), (pad0, pad1)))
    hp, wp = xf.shape[1], xf.shape[2]
    kf = k2d[::-1, ::-1]
    fh, fw = hp - kh + 1, wp - kw + 1
    acc = jnp.zeros((n * c, fh, fw), jnp.float32)
    for i in range(kh):
        for j in range(kw):
            acc = acc + float(kf[i, j]) * xf[:, i:i + fh, j:j + fw]
    out_h = (h + pad0 + pad1 - kh) // factor + 1
    out_w = (w + pad0 + pad1 - kw) // factor + 1
    out = acc[:, ::factor, ::factor][:, :out_h, :out_w]
    return out.reshape(n, c, out_h, out_w).astype(x.dtype)


if __name__ == "__main__":
    key = jax.random.PRNGKey(0)

    # Small NCHW input consistent with the module (factor-2 downsample: 16 -> 8).
    x = jax.random.normal(key, (2, 4, 16, 16), dtype=jnp.float32)
    out = jax.block_until_ready(downsample_pallas(x, kernel_taps=(1, 3, 3, 1), factor=2))
    ref = jax.block_until_ready(_downsample_reference(x, (1, 3, 3, 1), 2))
    assert out.shape == (2, 4, 8, 8), out.shape
    assert jnp.allclose(out, ref, atol=1e-5, rtol=1e-5), "mismatch vs reference (small)"

    # Second case with a lane-aligned channel count -> multi-step "parallel" grid
    # (exercises the 128-channel tiling and the zero-once padding path).
    x2 = jax.random.normal(jax.random.PRNGKey(0), (3, 128, 16, 16), dtype=jnp.float32)
    out2 = jax.block_until_ready(downsample_pallas(x2, kernel_taps=(1, 3, 3, 1), factor=2))
    ref2 = jax.block_until_ready(_downsample_reference(x2, (1, 3, 3, 1), 2))
    assert out2.shape == (3, 128, 8, 8), out2.shape
    assert jnp.allclose(out2, ref2, atol=1e-5, rtol=1e-5), "mismatch vs reference (tiled)"

    print("KERNEL_OK")
</pallas_src>

<mosaic_0001>
module attributes {stable_mosaic.version = 11 : i64} {
  func.func @kernel(%arg0: i32, %arg1: memref<16x16x8xf32, #tpu.memory_space<vmem>>, %arg2: memref<8x8x8xf32, #tpu.memory_space<vmem>>, %arg3: memref<18x18x8xf32, #tpu.memory_space<vmem>>, %arg4: memref<18x8x8xf32, #tpu.memory_space<vmem>>) attributes {dimension_semantics = [#tpu.dimension_semantics<parallel>], iteration_bounds = array<i64: 1>, scalar_prefetch = 0 : i64, scratch_operands = 2 : i64, tpu.core_type = #tpu.core_type<tc>, window_params = [{transform_indices = @transform_0, window_bounds = array<i64: 16, 16, 8>}, {transform_indices = @transform_1, window_bounds = array<i64: 8, 8, 8>}]} {
    %c0_i32 = arith.constant 0 : i32
    %0 = arith.cmpi eq, %arg0, %c0_i32 : i32
    %1 = arith.extui %0 : i1 to i32
    %c0_i32_0 = arith.constant 0 : i32
    %2 = arith.cmpi ne, %1, %c0_i32_0 : i32
    scf.if %2 {
      %cst_40 = arith.constant 0.000000e+00 : f32
      %37 = vector.broadcast %cst_40 : f32 to vector<18x18x8xf32>
      %c0_41 = arith.constant 0 : index
      %c0_42 = arith.constant 0 : index
      %c0_43 = arith.constant 0 : index
      %38 = vector.load %arg3[%c0_41, %c0_42, %c0_43] : memref<18x18x8xf32, #tpu.memory_space<vmem>>, vector<18x18x8xf32>
      tpu.vector_store %arg3[%c0_41, %c0_42, %c0_43], %37 {strides = array<i32>} : memref<18x18x8xf32, #tpu.memory_space<vmem>>, vector<18x18x8xf32>,
    } else {
    }
    %c0 = arith.constant 0 : index
    %c0_1 = arith.constant 0 : index
    %c0_2 = arith.constant 0 : index
    %3 = vector.load %arg1[%c0, %c0_1, %c0_2] : memref<16x16x8xf32, #tpu.memory_space<vmem>>, vector<16x16x8xf32>
    %c1 = arith.constant 1 : index
    %c1_3 = arith.constant 1 : index
    %c0_4 = arith.constant 0 : index
    %4 = vector.load %arg3[%c1, %c1_3, %c0_4] : memref<18x18x8xf32, #tpu.memory_space<vmem>>, vector<16x16x8xf32>
    tpu.vector_store %arg3[%c1, %c1_3, %c0_4], %3 {strides = array<i32>} : memref<18x18x8xf32, #tpu.memory_space<vmem>>, vector<16x16x8xf32>,
    %c0_5 = arith.constant 0 : index
    %c0_6 = arith.constant 0 : index
    %c0_7 = arith.constant 0 : index
    %5 = tpu.strided_load %arg3[%c0_5, %c0_6, %c0_7] {strides = array<i32: 1, 2, 1>} : memref<18x18x8xf32, #tpu.memory_space<vmem>>, vector<18x8x8xf32>
    %cst = arith.constant 1.250000e-01 : f32
    %6 = vector.broadcast %cst : f32 to vector<18x8x8xf32>
    %7 = arith.mulf %6, %5 : vector<18x8x8xf32>
    %c0_8 = arith.constant 0 : index
    %c1_9 = arith.constant 1 : index
    %c0_10 = arith.constant 0 : index
    %8 = tpu.strided_load %arg3[%c0_8, %c1_9, %c0_10] {strides = array<i32: 1, 2, 1>} : memref<18x18x8xf32, #tpu.memory_space<vmem>>, vector<18x8x8xf32>
    %cst_11 = arith.constant 3.750000e-01 : f32
    %9 = vector.broadcast %cst_11 : f32 to vector<18x8x8xf32>
    %10 = arith.mulf %9, %8 : vector<18x8x8xf32>
    %11 = arith.addf %7, %10 : vector<18x8x8xf32>
    %c0_12 = arith.constant 0 : index
    %c2 = arith.constant 2 : index
    %c0_13 = arith.constant 0 : index
    %12 = tpu.strided_load %arg3[%c0_12, %c2, %c0_13] {strides = array<i32: 1, 2, 1>} : memref<18x18x8xf32, #tpu.memory_space<vmem>>, vector<18x8x8xf32>
    %cst_14 = arith.constant 3.750000e-01 : f32
    %13 = vector.broadcast %cst_14 : f32 to vector<18x8x8xf32>
    %14 = arith.mulf %13, %12 : vector<18x8x8xf32>
    %15 = arith.addf %11, %14 : vector<18x8x8xf32>
    %c0_15 = arith.constant 0 : index
    %c3 = arith.constant 3 : index
    %c0_16 = arith.constant 0 : index
    %16 = tpu.strided_load %arg3[%c0_15, %c3, %c0_16] {strides = array<i32: 1, 2, 1>} : memref<18x18x8xf32, #tpu.memory_space<vmem>>, vector<18x8x8xf32>
    %cst_17 = arith.constant 1.250000e-01 : f32
    %17 = vector.broadcast %cst_17 : f32 to vector<18x8x8xf32>
    %18 = arith.mulf %17, %16 : vector<18x8x8xf32>
    %19 = arith.addf %15, %18 : vector<18x8x8xf32>
    %c0_18 = arith.constant 0 : index
    %c0_19 = arith.constant 0 : index
    %c0_20 = arith.constant 0 : index
    %20 = vector.load %arg4[%c0_18, %c0_19, %c0_20] : memref<18x8x8xf32, #tpu.memory_space<vmem>>, vector<18x8x8xf32>
    tpu.vector_store %arg4[%c0_18, %c0_19, %c0_20], %19 {strides = array<i32>} : memref<18x8x8xf32, #tpu.memory_space<vmem>>, vector<18x8x8xf32>,
    %c0_21 = arith.constant 0 : index
    %c0_22 = arith.constant 0 : index
    %c0_23 = arith.constant 0 : index
    %21 = tpu.strided_load %arg4[%c0_21, %c0_22, %c0_23] {strides = array<i32: 2, 1, 1>} : memref<18x8x8xf32, #tpu.memory_space<vmem>>, vector<8x8x8xf32>
    %cst_24 = arith.constant 1.250000e-01 : f32
    %22 = vector.broadcast %cst_24 : f32 to vector<8x8x8xf32>
    %23 = arith.mulf %22, %21 : vector<8x8x8xf32>
    %c1_25 = arith.constant 1 : index
    %c0_26 = arith.constant 0 : index
    %c0_27 = arith.constant 0 : index
    %24 = tpu.strided_load %arg4[%c1_25, %c0_26, %c0_27] {strides = array<i32: 2, 1, 1>} : memref<18x8x8xf32, #tpu.memory_space<vmem>>, vector<8x8x8xf32>
    %cst_28 = arith.constant 3.750000e-01 : f32
    %25 = vector.broadcast %cst_28 : f32 to vector<8x8x8xf32>
    %26 = arith.mulf %25, %24 : vector<8x8x8xf32>
    %27 = arith.addf %23, %26 : vector<8x8x8xf32>
    %c2_29 = arith.constant 2 : index
    %c0_30 = arith.constant 0 : index
    %c0_31 = arith.constant 0 : index
    %28 = tpu.strided_load %arg4[%c2_29, %c0_30, %c0_31] {strides = array<i32: 2, 1, 1>} : memref<18x8x8xf32, #tpu.memory_space<vmem>>, vector<8x8x8xf32>
    %cst_32 = arith.constant 3.750000e-01 : f32
    %29 = vector.broadcast %cst_32 : f32 to vector<8x8x8xf32>
    %30 = arith.mulf %29, %28 : vector<8x8x8xf32>
    %31 = arith.addf %27, %30 : vector<8x8x8xf32>
    %c3_33 = arith.constant 3 : index
    %c0_34 = arith.constant 0 : index
    %c0_35 = arith.constant 0 : index
    %32 = tpu.strided_load %arg4[%c3_33, %c0_34, %c0_35] {strides = array<i32: 2, 1, 1>} : memref<18x8x8xf32, #tpu.memory_space<vmem>>, vector<8x8x8xf32>
    %cst_36 = arith.constant 1.250000e-01 : f32
    %33 = vector.broadcast %cst_36 : f32 to vector<8x8x8xf32>
    %34 = arith.mulf %33, %32 : vector<8x8x8xf32>
    %35 = arith.addf %31, %34 : vector<8x8x8xf32>
    %c0_37 = arith.constant 0 : index
    %c0_38 = arith.constant 0 : index
    %c0_39 = arith.constant 0 : index
    %36 = vector.load %arg2[%c0_37, %c0_38, %c0_39] : memref<8x8x8xf32, #tpu.memory_space<vmem>>, vector<8x8x8xf32>
    tpu.vector_store %arg2[%c0_37, %c0_38, %c0_39], %35 {strides = array<i32>} : memref<8x8x8xf32, #tpu.memory_space<vmem>>, vector<8x8x8xf32>,
    return
  }
  func.func @transform_0(%arg0: i32) -> (i32, i32, i32) {
    %c0_i32 = arith.constant 0 : i32
    %c0_i32_0 = arith.constant 0 : i32
    %c0_i32_1 = arith.constant 0 : i32
    return %c0_i32, %c0_i32_0, %arg0 : i32, i32, i32
  }
  func.func @transform_1(%arg0: i32) -> (i32, i32, i32) {
    %c0_i32 = arith.constant 0 : i32
    %c0_i32_0 = arith.constant 0 : i32
    %c0_i32_1 = arith.constant 0 : i32
    return %c0_i32, %c0_i32_0, %arg0 : i32, i32, i32
  }
}

</mosaic_0001>

<bundles_post_ra>
// kernel: tpu_custom_call.1
= control target key start
LH: loop header
LB: loop body
LE: loop exit
PB: predicated region body
PF: predicated region fallthrough
CT: control target
= control target key end

     0   :  { %vm13_vm0 = vcmask 64512   ;;  %vm16_vm1 = vcmask 58368   ;;  %v565_v3 = vmov 0.0   ;;  %s803_s0 = inlined_call_operand.vmem [shape: f32[16,16,8], index: 0, kind: input, shape index: {}]   ;;  %s804_s1 = inlined_call_operand.hbm [shape: f32[8,8,8], index: 1, kind: output, shape index: {}]  }
   0x1   :  { %v69_v0 = vld [vmem:[%s803_s0] sm:$0xff]  ;;  %v70_v1 = vld [vmem:[%s803_s0 + $0x8] sm:$0xff]  ;;  %v71_v2 = vld [vmem:[%s803_s0 + $0x10] sm:$0xff]  ;;  %14 = vst.msk [vmem:[#allocation2] sm:$0xff] %vm13_vm0, %v565_v3 }
   0x2   :  { %15 = vst.msk [vmem:[#allocation2 + $0x8] sm:$0xff] %vm13_vm0, %v565_v3  ;;  %18 = vst.msk [vmem:[#allocation2 + $0x18] sm:$0xff] %vm13_vm0, %v565_v3  ;;  %v72_v4 = vld [vmem:[%s803_s0 + $0x18] sm:$0xff]  ;;  %v73_v5 = vld [vmem:[%s803_s0 + $0x20] sm:$0xff] }
   0x3   :  { %19 = vst.msk [vmem:[#allocation2 + $0x20] sm:$0xff] %vm13_vm0, %v565_v3  ;;  %21 = vst.msk [vmem:[#allocation2 + $0x30] sm:$0xff] %vm13_vm0, %v565_v3  ;;  %v74_v6 = vld [vmem:[%s803_s0 + $0x28] sm:$0xff]  ;;  %v75_v7 = vld [vmem:[%s803_s0 + $0x30] sm:$0xff] }
   0x4   :  { %22 = vst.msk [vmem:[#allocation2 + $0x38] sm:$0xff] %vm13_vm0, %v565_v3  ;;  %24 = vst.msk [vmem:[#allocation2 + $0x48] sm:$0xff] %vm13_vm0, %v565_v3  ;;  %v76_v8 = vld [vmem:[%s803_s0 + $0x38] sm:$0xff]  ;;  %v77_v9 = vld [vmem:[%s803_s0 + $0x40] sm:$0xff] }
   0x5   :  { %25 = vst.msk [vmem:[#allocation2 + $0x50] sm:$0xff] %vm13_vm0, %v565_v3  ;;  %27 = vst.msk [vmem:[#allocation2 + $0x60] sm:$0xff] %vm13_vm0, %v565_v3  ;;  %v78_v10 = vld [vmem:[%s803_s0 + $0x48] sm:$0xff]  ;;  %v79_v11 = vld [vmem:[%s803_s0 + $0x50] sm:$0xff] }
   0x6   :  { %28 = vst.msk [vmem:[#allocation2 + $0x68] sm:$0xff] %vm13_vm0, %v565_v3  ;;  %30 = vst.msk [vmem:[#allocation2 + $0x78] sm:$0xff] %vm13_vm0, %v565_v3  ;;  %v80_v12 = vld [vmem:[%s803_s0 + $0x58] sm:$0xff]  ;;  %v81_v13 = vld [vmem:[%s803_s0 + $0x60] sm:$0xff] }
   0x7   :  { %31 = vst.msk [vmem:[#allocation2 + $0x80] sm:$0xff] %vm13_vm0, %v565_v3  ;;  %33 = vst.msk [vmem:[#allocation2 + $0x90] sm:$0xff] %vm13_vm0, %v565_v3  ;;  %v82_v14 = vld [vmem:[%s803_s0 + $0x68] sm:$0xff]  ;;  %v83_v15 = vld [vmem:[%s803_s0 + $0x70] sm:$0xff] }
   0x8   :  { %34 = vst.msk [vmem:[#allocation2 + $0x98] sm:$0xff] %vm13_vm0, %v565_v3  ;;  %36 = vst.msk [vmem:[#allocation2 + $0xa8] sm:$0xff] %vm13_vm0, %v565_v3  ;;  %v84_v16 = vld [vmem:[%s803_s0 + $0x78] sm:$0xff]  ;;  %v85_v17 = vld [vmem:[%s803_s0 + $0x80] sm:$0xff] }
   0x9   :  { %37 = vst.msk [vmem:[#allocation2 + $0xb0] sm:$0xff] %vm13_vm0, %v565_v3  ;;  %39 = vst.msk [vmem:[#allocation2 + $0xc0] sm:$0xff] %vm13_vm0, %v565_v3  ;;  %v86_v18 = vld [vmem:[%s803_s0 + $0x88] sm:$0xff]  ;;  %v87_v19 = vld [vmem:[%s803_s0 + $0x90] sm:$0xff] }
   0xa   :  { %40 = vst.msk [vmem:[#allocation2 + $0xc8] sm:$0xff] %vm13_vm0, %v565_v3  ;;  %42 = vst.msk [vmem:[#allocation2 + $0xd8] sm:$0xff] %vm13_vm0, %v565_v3  ;;  %v88_v20 = vld [vmem:[%s803_s0 + $0x98] sm:$0xff]  ;;  %v89_v21 = vld [vmem:[%s803_s0 + $0xa0] sm:$0xff] }
   0xb   :  { %43 = vst.msk [vmem:[#allocation2 + $0xe0] sm:$0xff] %vm13_vm0, %v565_v3  ;;  %45 = vst.msk [vmem:[#allocation2 + $0xf0] sm:$0xff] %vm13_vm0, %v565_v3  ;;  %v90_v22 = vld [vmem:[%s803_s0 + $0xa8] sm:$0xff]  ;;  %v91_v23 = vld [vmem:[%s803_s0 + $0xb0] sm:$0xff] }
   0xc   :  { %46 = vst.msk [vmem:[#allocation2 + $0xf8] sm:$0xff] %vm13_vm0, %v565_v3  ;;  %48 = vst.msk [vmem:[#allocation2 + $0x108] sm:$0xff] %vm13_vm0, %v565_v3  ;;  %v92_v24 = vld [vmem:[%s803_s0 + $0xb8] sm:$0xff]  ;;  %v93_v25 = vld [vmem:[%s803_s0 + $0xc0] sm:$0xff] }
   0xd   :  { %49 = vst.msk [vmem:[#allocation2 + $0x110] sm:$0xff] %vm13_vm0, %v565_v3  ;;  %51 = vst.msk [vmem:[#allocation2 + $0x120] sm:$0xff] %vm13_vm0, %v565_v3  ;;  %v94_v26 = vld [vmem:[%s803_s0 + $0xc8] sm:$0xff]  ;;  %v95_v27 = vld [vmem:[%s803_s0 + $0xd0] sm:$0xff] }
   0xe   :  { %52 = vst.msk [vmem:[#allocation2 + $0x128] sm:$0xff] %vm13_vm0, %v565_v3  ;;  %54 = vst.msk [vmem:[#allocation2 + $0x138] sm:$0xff] %vm13_vm0, %v565_v3  ;;  %v96_v28 = vld [vmem:[%s803_s0 + $0xd8] sm:$0xff]  ;;  %v97_v29 = vld [vmem:[%s803_s0 + $0xe0] sm:$0xff] }
   0xf   :  { %55 = vst.msk [vmem:[#allocation2 + $0x140] sm:$0xff] %vm13_vm0, %v565_v3  ;;  %57 = vst.msk [vmem:[#allocation2 + $0x150] sm:$0xff] %vm13_vm0, %v565_v3  ;;  %v98_v30 = vld [vmem:[%s803_s0 + $0xe8] sm:$0xff]  ;;  %v99_v31 = vld [vmem:[%s803_s0 + $0xf0] sm:$0xff] }
  0x10   :  { %58 = vst.msk [vmem:[#allocation2 + $0x158] sm:$0xff] %vm13_vm0, %v565_v3  ;;  %60 = vst.msk [vmem:[#allocation2 + $0x168] sm:$0xff] %vm13_vm0, %v565_v3  ;;  %v100_v32 = vld [vmem:[%s803_s0 + $0xf8] sm:$0xff]  ;;  %v135_v33 = vld [vmem:[#allocation2] ss:$2 sm:$0xff] }
  0x11   :  { %61 = vst.msk [vmem:[#allocation2 + $0x170] sm:$0xff] %vm13_vm0, %v565_v3  ;;  %63 = vst.msk [vmem:[#allocation2 + $0x180] sm:$0xff] %vm13_vm0, %v565_v3  ;;  %v170_v34 = vmul.f32 0.125, %v135_v33  ;;  %v189_v35 = vld [vmem:[#allocation2 + $0x1] ss:$2 sm:$0xff] }
  0x12   :  { %64 = vst.msk [vmem:[#allocation2 + $0x188] sm:$0xff] %vm13_vm0, %v565_v3  ;;  %66 = vst.msk [vmem:[#allocation2 + $0x198] sm:$0xff] %vm13_vm0, %v565_v3  ;;  %v224_v37 = vmul.f32 0.375, %v189_v35 }
  0x13   :  { %67 = vst.msk [vmem:[#allocation2 + $0x1a0] sm:$0xff] %vm13_vm0, %v565_v3  ;;  %103 = vst.msk [vmem:[#allocation2 + $0x19] sm:$0xff] %vm13_vm0, %v69_v0 }
  0x14   :  { %20 = vst.msk [vmem:[#allocation2 + $0x28] sm:$0x3] %vm16_vm1, %v565_v3  ;;  %17 = vst.msk [vmem:[#allocation2 + $0x10] sm:$0x3] %vm16_vm1, %v565_v3  ;;  %v242_v44 = vadd.f32 %v224_v37, %v170_v34 }
  0x15   :  { %23 = vst.msk [vmem:[#allocation2 + $0x40] sm:$0x3] %vm16_vm1, %v565_v3  ;;  %26 = vst.msk [vmem:[#allocation2 + $0x58] sm:$0x3] %vm16_vm1, %v565_v3 }
  0x16   :  { %29 = vst.msk [vmem:[#allocation2 + $0x70] sm:$0x3] %vm16_vm1, %v565_v3  ;;  %32 = vst.msk [vmem:[#allocation2 + $0x88] sm:$0x3] %vm16_vm1, %v565_v3 }
  0x17   :  { %35 = vst.msk [vmem:[#allocation2 + $0xa0] sm:$0x3] %vm16_vm1, %v565_v3  ;;  %38 = vst.msk [vmem:[#allocation2 + $0xb8] sm:$0x3] %vm16_vm1, %v565_v3 }
  0x18   :  { %41 = vst.msk [vmem:[#allocation2 + $0xd0] sm:$0x3] %vm16_vm1, %v565_v3  ;;  %44 = vst.msk [vmem:[#allocation2 + $0xe8] sm:$0x3] %vm16_vm1, %v565_v3 }
  0x19   :  { %47 = vst.msk [vmem:[#allocation2 + $0x100] sm:$0x3] %vm16_vm1, %v565_v3  ;;  %50 = vst.msk [vmem:[#allocation2 + $0x118] sm:$0x3] %vm16_vm1, %v565_v3 }
  0x1a   :  { %53 = vst.msk [vmem:[#allocation2 + $0x130] sm:$0x3] %vm16_vm1, %v565_v3  ;;  %56 = vst.msk [vmem:[#allocation2 + $0x148] sm:$0x3] %vm16_vm1, %v565_v3 }
  0x1b   :  { %59 = vst.msk [vmem:[#allocation2 + $0x160] sm:$0x3] %vm16_vm1, %v565_v3  ;;  %62 = vst.msk [vmem:[#allocation2 + $0x178] sm:$0x3] %vm16_vm1, %v565_v3  ;;  %v261_v36 = vld [vmem:[#allocation2 + $0x2] ss:$2 sm:$0xff] }
  0x1c   :  { %65 = vst.msk [vmem:[#allocation2 + $0x190] sm:$0x3] %vm16_vm1, %v565_v3  ;;  %68 = vst.msk [vmem:[#allocation2 + $0x1a8] sm:$0x3] %vm16_vm1, %v565_v3  ;;  %v296_v38 = vmul.f32 0.375, %v261_v36 }
  0x1d   :  { %104 = vst.msk [vmem:[#allocation2 + $0x21] sm:$0xff] %vm13_vm0, %v70_v1  ;;  %105 = vst.msk [vmem:[#allocation2 + $0x31] sm:$0xff] %vm13_vm0, %v71_v2  ;;  %v333_v39 = vld [vmem:[#allocation2 + $0x3] ss:$2 sm:$0xff] }
  0x1e   :  { %106 = vst.msk [vmem:[#allocation2 + $0x39] sm:$0xff] %vm13_vm0, %v72_v4  ;;  %107 = vst.msk [vmem:[#allocation2 + $0x49] sm:$0xff] %vm13_vm0, %v73_v5  ;;  %v368_v45 = vmul.f32 0.125, %v333_v39  ;;  %v314_v53 = vadd.f32 %v296_v38, %v242_v44 }
  0x1f   :  { %108 = vst.msk [vmem:[#allocation2 + $0x51] sm:$0xff] %vm13_vm0, %v74_v6  ;;  %109 = vst.msk [vmem:[#allocation2 + $0x61] sm:$0xff] %vm13_vm0, %v75_v7 }
  0x20   :  { %110 = vst.msk [vmem:[#allocation2 + $0x69] sm:$0xff] %vm13_vm0, %v76_v8  ;;  %111 = vst.msk [vmem:[#allocation2 + $0x79] sm:$0xff] %vm13_vm0, %v77_v9  ;;  %v386_v63 = vadd.f32 %v368_v45, %v314_v53 }
  0x21   :  { %112 = vst.msk [vmem:[#allocation2 + $0x81] sm:$0xff] %vm13_vm0, %v78_v10  ;;  %113 = vst.msk [vmem:[#allocation2 + $0x91] sm:$0xff] %vm13_vm0, %v79_v11 }
  0x22   :  { %114 = vst.msk [vmem:[#allocation2 + $0x99] sm:$0xff] %vm13_vm0, %v80_v12  ;;  %115 = vst.msk [vmem:[#allocation2 + $0xa9] sm:$0xff] %vm13_vm0, %v81_v13 }
  0x23   :  { %116 = vst.msk [vmem:[#allocation2 + $0xb1] sm:$0xff] %vm13_vm0, %v82_v14  ;;  %117 = vst.msk [vmem:[#allocation2 + $0xc1] sm:$0xff] %vm13_vm0, %v83_v15 }
  0x24   :  { %118 = vst.msk [vmem:[#allocation2 + $0xc9] sm:$0xff] %vm13_vm0, %v84_v16  ;;  %119 = vst.msk [vmem:[#allocation2 + $0xd9] sm:$0xff] %vm13_vm0, %v85_v17  ;;  %v137_v40 = vld [vmem:[#allocation2 + $0x18] ss:$2 sm:$0xff]  ;;  %v191_v42 = vld [vmem:[#allocation2 + $0x19] ss:$2 sm:$0xff] }
  0x25   :  { %120 = vst.msk [vmem:[#allocation2 + $0xe1] sm:$0xff] %vm13_vm0, %v86_v18  ;;  %121 = vst.msk [vmem:[#allocation2 + $0xf1] sm:$0xff] %vm13_vm0, %v87_v19  ;;  %v171_v41 = vmul.f32 0.125, %v137_v40  ;;  %v263_v43 = vld [vmem:[#allocation2 + $0x1a] ss:$2 sm:$0xff]  ;;  %v225_v46 = vmul.f32 0.375, %v191_v42 }
  0x26   :  { %122 = vst.msk [vmem:[#allocation2 + $0xf9] sm:$0xff] %vm13_vm0, %v88_v20  ;;  %123 = vst.msk [vmem:[#allocation2 + $0x109] sm:$0xff] %vm13_vm0, %v89_v21  ;;  %v335_v47 = vld [vmem:[#allocation2 + $0x1b] ss:$2 sm:$0xff]  ;;  %v139_v48 = vld [vmem:[#allocation2 + $0x30] ss:$2 sm:$0xff] }
  0x27   :  { %124 = vst.msk [vmem:[#allocation2 + $0x111] sm:$0xff] %vm13_vm0, %v90_v22  ;;  %125 = vst.msk [vmem:[#allocation2 + $0x121] sm:$0xff] %vm13_vm0, %v91_v23  ;;  %v297_v49 = vmul.f32 0.375, %v263_v43  ;;  %v172_v50 = vmul.f32 0.125, %v139_v48  ;;  %v193_v51 = vld [vmem:[#allocation2 + $0x31] ss:$2 sm:$0xff]  ;;  %v243_v54 = vadd.f32 %v225_v46, %v171_v41 }
  0x28   :  { %126 = vst.msk [vmem:[#allocation2 + $0x129] sm:$0xff] %vm13_vm0, %v92_v24  ;;  %127 = vst.msk [vmem:[#allocation2 + $0x139] sm:$0xff] %vm13_vm0, %v93_v25  ;;  %v265_v52 = vld [vmem:[#allocation2 + $0x32] ss:$2 sm:$0xff]  ;;  %v369_v55 = vmul.f32 0.125, %v335_v47  ;;  %v226_v56 = vmul.f32 0.375, %v193_v51 }
  0x29   :  { %128 = vst.msk [vmem:[#allocation2 + $0x141] sm:$0xff] %vm13_vm0, %v94_v26  ;;  %129 = vst.msk [vmem:[#allocation2 + $0x151] sm:$0xff] %vm13_vm0, %v95_v27  ;;  %v337_v57 = vld [vmem:[#allocation2 + $0x33] ss:$2 sm:$0xff]  ;;  %v141_v58 = vld [vmem:[#allocation2 + $0x48] ss:$2 sm:$0xff]  ;;  %v315_v0 = vadd.f32 %v297_v49, %v243_v54 }
  0x2a   :  { %130 = vst.msk [vmem:[#allocation2 + $0x159] sm:$0xff] %vm13_vm0, %v96_v28  ;;  %131 = vst.msk [vmem:[#allocation2 + $0x169] sm:$0xff] %vm13_vm0, %v97_v29  ;;  %v298_v59 = vmul.f32 0.375, %v265_v52  ;;  %v173_v60 = vmul.f32 0.125, %v141_v58  ;;  %v195_v61 = vld [vmem:[#allocation2 + $0x49] ss:$2 sm:$0xff]  ;;  %v244_v1 = vadd.f32 %v226_v56, %v172_v50 }
  0x2b   :  { %132 = vst.msk [vmem:[#allocation2 + $0x171] sm:$0xff] %vm13_vm0, %v98_v30  ;;  %133 = vst.msk [vmem:[#allocation2 + $0x181] sm:$0xff] %vm13_vm0, %v99_v31  ;;  %v267_v62 = vld [vmem:[#allocation2 + $0x4a] ss:$2 sm:$0xff]  ;;  %v227_v2 = vmul.f32 0.375, %v195_v61  ;;  %v370_v5 = vmul.f32 0.125, %v337_v57  ;;  %v387_v9 = vadd.f32 %v369_v55, %v315_v0 }
  0x2c   :  { %134 = vst.msk [vmem:[#allocation2 + $0x189] sm:$0xff] %vm13_vm0, %v100_v32  ;;  %v339_v3 = vld [vmem:[#allocation2 + $0x4b] ss:$2 sm:$0xff]  ;;  %v143_v4 = vld [vmem:[#allocation2 + $0x60] ss:$2 sm:$0xff]  ;;  %v299_v6 = vmul.f32 0.375, %v267_v62  ;;  %v316_v10 = vadd.f32 %v298_v59, %v244_v1 }
  0x2d   :  { %v174_v7 = vmul.f32 0.125, %v143_v4  ;;  %v197_v8 = vld [vmem:[#allocation2 + $0x61] ss:$2 sm:$0xff]  ;;  %404 = vst.msk [vmem:[#allocation3] sm:$0xff] %vm13_vm0, %v386_v63  ;;  %v245_v11 = vadd.f32 %v227_v2, %v173_v60  ;;  %v269_v13 = vld [vmem:[#allocation2 + $0x62] ss:$2 sm:$0xff] }
  0x2e   :  { %v228_v12 = vmul.f32 0.375, %v197_v8  ;;  %v341_v14 = vld [vmem:[#allocation2 + $0x63] ss:$2 sm:$0xff]  ;;  %v371_v15 = vmul.f32 0.125, %v339_v3  ;;  %v300_v16 = vmul.f32 0.375, %v269_v13  ;;  %405 = vst.msk [vmem:[#allocation3 + $0x8] sm:$0xff] %vm13_vm0, %v387_v9  ;;  %v388_v19 = vadd.f32 %v370_v5, %v316_v10 }
  0x2f   :  { %v145_v17 = vld [vmem:[#allocation2 + $0x78] ss:$2 sm:$0xff]  ;;  %v199_v18 = vld [vmem:[#allocation2 + $0x79] ss:$2 sm:$0xff]  ;;  %v317_v20 = vadd.f32 %v299_v6, %v245_v11  ;;  %v372_v25 = vmul.f32 0.125, %v341_v14 }
  0x30   :  { %v246_v21 = vadd.f32 %v228_v12, %v174_v7  ;;  %v175_v22 = vmul.f32 0.125, %v145_v17  ;;  %v271_v23 = vld [vmem:[#allocation2 + $0x7a] ss:$2 sm:$0xff]  ;;  %v343_v24 = vld [vmem:[#allocation2 + $0x7b] ss:$2 sm:$0xff]  ;;  %v229_v26 = vmul.f32 0.375, %v199_v18 }
  0x31   :  { %v147_v27 = vld [vmem:[#allocation2 + $0x90] ss:$2 sm:$0xff]  ;;  %406 = vst.msk [vmem:[#allocation3 + $0x10] sm:$0xff] %vm13_vm0, %v388_v19  ;;  %v389_v28 = vadd.f32 %v371_v15, %v317_v20  ;;  %v301_v30 = vmul.f32 0.375, %v271_v23  ;;  %v201_v32 = vld [vmem:[#allocation2 + $0x91] ss:$2 sm:$0xff] }
  0x32   :  { %v318_v29 = vadd.f32 %v300_v16, %v246_v21  ;;  %v176_v31 = vmul.f32 0.125, %v147_v27  ;;  %v273_v33 = vld [vmem:[#allocation2 + $0x92] ss:$2 sm:$0xff]  ;;  %v247_v34 = vadd.f32 %v229_v26, %v175_v22  ;;  %v373_v35 = vmul.f32 0.125, %v343_v24  ;;  %v345_v37 = vld [vmem:[#allocation2 + $0x93] ss:$2 sm:$0xff] }
  0x33   :  { %v230_v36 = vmul.f32 0.375, %v201_v32  ;;  %v149_v38 = vld [vmem:[#allocation2 + $0xa8] ss:$2 sm:$0xff]  ;;  %407 = vst.msk [vmem:[#allocation3 + $0x18] sm:$0xff] %vm13_vm0, %v389_v28  ;;  %v302_v40 = vmul.f32 0.375, %v273_v33  ;;  %v374_v46 = vmul.f32 0.125, %v345_v37 }
  0x34   :  { %v390_v39 = vadd.f32 %v372_v25, %v318_v29  ;;  %v177_v41 = vmul.f32 0.125, %v149_v38  ;;  %v203_v42 = vld [vmem:[#allocation2 + $0xa9] ss:$2 sm:$0xff]  ;;  %v275_v43 = vld [vmem:[#allocation2 + $0xaa] ss:$2 sm:$0xff]  ;;  %v319_v44 = vadd.f32 %v301_v30, %v247_v34 }
  0x35   :  { %v248_v45 = vadd.f32 %v230_v36, %v176_v31  ;;  %v231_v47 = vmul.f32 0.375, %v203_v42  ;;  %v347_v48 = vld [vmem:[#allocation2 + $0xab] ss:$2 sm:$0xff]  ;;  %v151_v49 = vld [vmem:[#allocation2 + $0xc0] ss:$2 sm:$0xff]  ;;  %v303_v50 = vmul.f32 0.375, %v275_v43 }
  0x36   :  { %408 = vst.msk [vmem:[#allocation3 + $0x20] sm:$0xff] %vm13_vm0, %v390_v39  ;;  %v178_v51 = vmul.f32 0.125, %v151_v49  ;;  %v205_v52 = vld [vmem:[#allocation2 + $0xc1] ss:$2 sm:$0xff]  ;;  %v277_v53 = vld [vmem:[#allocation2 + $0xc2] ss:$2 sm:$0xff]  ;;  %v391_v54 = vadd.f32 %v373_v35, %v319_v44 }
  0x37   :  { %v320_v55 = vadd.f32 %v302_v40, %v248_v45  ;;  %v249_v56 = vadd.f32 %v231_v47, %v177_v41  ;;  %v232_v57 = vmul.f32 0.375, %v205_v52  ;;  %v349_v58 = vld [vmem:[#allocation2 + $0xc3] ss:$2 sm:$0xff]  ;;  %v153_v59 = vld [vmem:[#allocation2 + $0xd8] ss:$2 sm:$0xff]  ;;  %v375_v61 = vmul.f32 0.125, %v347_v48 }
  0x38   :  { %v422_v60 = vld [vmem:[#allocation3] sm:$0xff]  ;;  %v304_v62 = vmul.f32 0.375, %v277_v53  ;;  %v376_v63 = vmul.f32 0.125, %v349_v58  ;;  %v179_v0 = vmul.f32 0.125, %v153_v59  ;;  %v207_v1 = vld [vmem:[#allocation2 + $0xd9] ss:$2 sm:$0xff] }
  0x39   :  { %409 = vst.msk [vmem:[#allocation3 + $0x28] sm:$0xff] %vm13_vm0, %v391_v54  ;;  %v392_v2 = vadd.f32 %v374_v46, %v320_v55  ;;  %v321_v3 = vadd.f32 %v303_v50, %v249_v56  ;;  %v250_v4 = vadd.f32 %v232_v57, %v178_v51  ;;  %v233_v5 = vmul.f32 0.375, %v207_v1  ;;  %v279_v6 = vld [vmem:[#allocation2 + $0xda] ss:$2 sm:$0xff]  ;;  %v351_v7 = vld [vmem:[#allocation2 + $0xdb] ss:$2 sm:$0xff] }
  0x3a   :  { %v439_v8 = vld [vmem:[#allocation3 + $0x8] sm:$0xff]  ;;  %v305_v9 = vmul.f32 0.375, %v279_v6  ;;  %v430_v12 = vmul.f32 0.125, %v422_v60  ;;  %v768_v19 = vld [vmem:[#allocation3 + $0x10] sm:$0xff]  ;;  %v377_v20 = vmul.f32 0.125, %v351_v7  ;;  %v489_v59 = vld [vmem:[#allocation3 + $0x18] sm:$0xff] }
  0x3b   :  { %v155_v10 = vld [vmem:[#allocation2 + $0xf0] ss:$2 sm:$0xff]  ;;  %v209_v11 = vld [vmem:[#allocation2 + $0xf1] ss:$2 sm:$0xff]  ;;  %410 = vst.msk [vmem:[#allocation3 + $0x30] sm:$0xff] %vm13_vm0, %v392_v2  ;;  %v393_v13 = vadd.f32 %v375_v61, %v321_v3  ;;  %v322_v14 = vadd.f32 %v304_v62, %v250_v4  ;;  %v251_v15 = vadd.f32 %v233_v5, %v179_v0  ;;  %v447_v24 = vmul.f32 0.375, %v439_v8 }
  0x3c   :  { %v180_v16 = vmul.f32 0.125, %v155_v10  ;;  %v281_v17 = vld [vmem:[#allocation2 + $0xf2] ss:$2 sm:$0xff]  ;;  %v353_v18 = vld [vmem:[#allocation2 + $0xf3] ss:$2 sm:$0xff]  ;;  %v234_v21 = vmul.f32 0.375, %v209_v11 }
  0x3d   :  { %v306_v22 = vmul.f32 0.375, %v281_v17  ;;  %v157_v23 = vld [vmem:[#allocation2 + $0x108] ss:$2 sm:$0xff]  ;;  %411 = vst.msk [vmem:[#allocation3 + $0x38] sm:$0xff] %vm13_vm0, %v393_v13  ;;  %v394_v25 = vadd.f32 %v376_v63, %v322_v14  ;;  %v323_v26 = vadd.f32 %v305_v9, %v251_v15  ;;  %v378_v27 = vmul.f32 0.125, %v353_v18 }
  0x3e   :  { %v181_v28 = vmul.f32 0.125, %v157_v23  ;;  %v211_v29 = vld [vmem:[#allocation2 + $0x109] ss:$2 sm:$0xff]  ;;  %v283_v30 = vld [vmem:[#allocation2 + $0x10a] ss:$2 sm:$0xff]  ;;  %v252_v31 = vadd.f32 %v234_v21, %v180_v16  ;;  %v455_v35 = vadd.f32 %v447_v24, %v430_v12  ;;  %v472_v36 = vmul.f32 0.375, %v768_v19 }
  0x3f   :  { %v235_v32 = vmul.f32 0.375, %v211_v29  ;;  %v355_v33 = vld [vmem:[#allocation2 + $0x10b] ss:$2 sm:$0xff]  ;;  %v159_v34 = vld [vmem:[#allocation2 + $0x120] ss:$2 sm:$0xff]  ;;  %412 = vst.msk [vmem:[#allocation3 + $0x40] sm:$0xff] %vm13_vm0, %v394_v25  ;;  %v395_v37 = vadd.f32 %v377_v20, %v323_v26 }
  0x40   :  { %v307_v38 = vmul.f32 0.375, %v283_v30  ;;  %v182_v39 = vmul.f32 0.125, %v159_v34  ;;  %v213_v40 = vld [vmem:[#allocation2 + $0x121] ss:$2 sm:$0xff]  ;;  %v285_v41 = vld [vmem:[#allocation2 + $0x122] ss:$2 sm:$0xff]  ;;  %v324_v42 = vadd.f32 %v306_v22, %v252_v31  ;;  %v480_v52 = vadd.f32 %v472_v36, %v455_v35 }
  0x41   :  { %v253_v43 = vadd.f32 %v235_v32, %v181_v28  ;;  %v379_v44 = vmul.f32 0.125, %v355_v33  ;;  %v236_v45 = vmul.f32 0.375, %v213_v40  ;;  %v357_v46 = vld [vmem:[#allocation2 + $0x123] ss:$2 sm:$0xff]  ;;  %v161_v47 = vld [vmem:[#allocation2 + $0x138] ss:$2 sm:$0xff] }
  0x42   :  { %413 = vst.msk [vmem:[#allocation3 + $0x48] sm:$0xff] %vm13_vm0, %v395_v37  ;;  %v308_v48 = vmul.f32 0.375, %v285_v41  ;;  %v183_v49 = vmul.f32 0.125, %v161_v47  ;;  %v215_v50 = vld [vmem:[#allocation2 + $0x139] ss:$2 sm:$0xff]  ;;  %v396_v53 = vadd.f32 %v378_v27, %v324_v42  ;;  %v380_v60 = vmul.f32 0.125, %v357_v46 }
  0x43   :  { %v287_v51 = vld [vmem:[#allocation2 + $0x13a] ss:$2 sm:$0xff]  ;;  %v325_v54 = vadd.f32 %v307_v38, %v253_v43  ;;  %v254_v55 = vadd.f32 %v236_v45, %v182_v39  ;;  %v237_v56 = vmul.f32 0.375, %v215_v50  ;;  %v359_v57 = vld [vmem:[#allocation2 + $0x13b] ss:$2 sm:$0xff]  ;;  %v497_v0 = vmul.f32 0.125, %v489_v59 }
  0x44   :  { %v163_v58 = vld [vmem:[#allocation2 + $0x150] ss:$2 sm:$0xff]  ;;  %v309_v61 = vmul.f32 0.375, %v287_v51  ;;  %v217_v63 = vld [vmem:[#allocation2 + $0x151] ss:$2 sm:$0xff]  ;;  %414 = vst.msk [vmem:[#allocation3 + $0x50] sm:$0xff] %vm13_vm0, %v396_v53 }
  0x45   :  { %v184_v62 = vmul.f32 0.125, %v163_v58  ;;  %v397_v1 = vadd.f32 %v379_v44, %v325_v54  ;;  %v326_v2 = vadd.f32 %v308_v48, %v254_v55  ;;  %v255_v3 = vadd.f32 %v237_v56, %v183_v49  ;;  %v289_v5 = vld [vmem:[#allocation2 + $0x152] ss:$2 sm:$0xff]  ;;  %v361_v6 = vld [vmem:[#allocation2 + $0x153] ss:$2 sm:$0xff] }
  0x46   :  { %v238_v4 = vmul.f32 0.375, %v217_v63  ;;  %v381_v7 = vmul.f32 0.125, %v359_v57  ;;  %v310_v8 = vmul.f32 0.375, %v289_v5  ;;  %v165_v9 = vld [vmem:[#allocation2 + $0x168] ss:$2 sm:$0xff]  ;;  %v505_v11 = vadd.f32 %v497_v0, %v480_v52  ;;  %v490_v31 = vld [vmem:[#allocation3 + $0x28] sm:$0xff] }
  0x47   :  { %v219_v10 = vld [vmem:[#allocation2 + $0x169] ss:$2 sm:$0xff]  ;;  %415 = vst.msk [vmem:[#allocation3 + $0x58] sm:$0xff] %vm13_vm0, %v397_v1  ;;  %v398_v12 = vadd.f32 %v380_v60, %v326_v2  ;;  %v327_v13 = vadd.f32 %v309_v61, %v255_v3  ;;  %v185_v15 = vmul.f32 0.125, %v165_v9  ;;  %v291_v16 = vld [vmem:[#allocation2 + $0x16a] ss:$2 sm:$0xff] }
  0x48   :  { %v256_v14 = vadd.f32 %v238_v4, %v184_v62  ;;  %v363_v17 = vld [vmem:[#allocation2 + $0x16b] ss:$2 sm:$0xff]  ;;  %v382_v18 = vmul.f32 0.125, %v361_v6  ;;  %v239_v20 = vmul.f32 0.375, %v219_v10  ;;  %v311_v21 = vmul.f32 0.375, %v291_v16  ;;  %513 = vst.msk [vmem:[#allocation4] sm:$0xff] %vm13_vm0, %v505_v11 }
  0x49   :  { %v167_v22 = vld [vmem:[#allocation2 + $0x180] ss:$2 sm:$0xff]  ;;  %v431_v23 = vmul.f32 0.125, %v768_v19  ;;  %v465_v24 = vld [vmem:[#allocation3 + $0x20] sm:$0xff]  ;;  %416 = vst.msk [vmem:[#allocation3 + $0x60] sm:$0xff] %vm13_vm0, %v398_v12  ;;  %v399_v25 = vadd.f32 %v381_v7, %v327_v13  ;;  %v448_v30 = vmul.f32 0.375, %v489_v59 }
  0x4a   :  { %v328_v26 = vadd.f32 %v310_v8, %v256_v14  ;;  %v186_v27 = vmul.f32 0.125, %v167_v22  ;;  %v221_v28 = vld [vmem:[#allocation2 + $0x181] ss:$2 sm:$0xff]  ;;  %v293_v29 = vld [vmem:[#allocation2 + $0x182] ss:$2 sm:$0xff]  ;;  %v257_v32 = vadd.f32 %v239_v20, %v185_v15  ;;  %v383_v38 = vmul.f32 0.125, %v363_v17 }
  0x4b   :  { %v240_v33 = vmul.f32 0.375, %v221_v28  ;;  %v312_v34 = vmul.f32 0.375, %v293_v29  ;;  %v365_v35 = vld [vmem:[#allocation2 + $0x183] ss:$2 sm:$0xff]  ;;  %v169_v36 = vld [vmem:[#allocation2 + $0x198] ss:$2 sm:$0xff]  ;;  %v456_v41 = vadd.f32 %v448_v30, %v431_v23 }
  0x4c   :  { %417 = vst.msk [vmem:[#allocation3 + $0x68] sm:$0xff] %vm13_vm0, %v399_v25  ;;  %v400_v37 = vadd.f32 %v382_v18, %v328_v26  ;;  %v187_v19 = vmul.f32 0.125, %v169_v36  ;;  %v223_v39 = vld [vmem:[#allocation2 + $0x199] ss:$2 sm:$0xff]  ;;  %v295_v40 = vld [vmem:[#allocation2 + $0x19a] ss:$2 sm:$0xff]  ;;  %v329_v42 = vadd.f32 %v311_v21, %v257_v32 }
  0x4d   :  { %v258_v43 = vadd.f32 %v240_v33, %v186_v27  ;;  %v241_v44 = vmul.f32 0.375, %v223_v39  ;;  %v313_v45 = vmul.f32 0.375, %v295_v40  ;;  %v367_v46 = vld [vmem:[#allocation2 + $0x19b] ss:$2 sm:$0xff]  ;;  %v384_v48 = vmul.f32 0.125, %v365_v35  ;;  %v467_v57 = vld [vmem:[#allocation3 + $0x40] sm:$0xff] }
  0x4e   :  { %v466_v47 = vld [vmem:[#allocation3 + $0x30] sm:$0xff]  ;;  %418 = vst.msk [vmem:[#allocation3 + $0x70] sm:$0xff] %vm13_vm0, %v400_v37  ;;  %v385_v49 = vmul.f32 0.125, %v367_v46  ;;  %v473_v50 = vmul.f32 0.375, %v465_v24  ;;  %v432_v51 = vmul.f32 0.125, %v465_v24  ;;  %v491_v52 = vld [vmem:[#allocation3 + $0x38] sm:$0xff]  ;;  %v401_v53 = vadd.f32 %v383_v38, %v329_v42 }
  0x4f   :  { %v330_v54 = vadd.f32 %v312_v34, %v258_v43  ;;  %v259_v55 = vadd.f32 %v241_v44, %v187_v19  ;;  %v449_v56 = vmul.f32 0.375, %v490_v31 }
  0x50   :  { %6 = vsyncpa [#allocation5], 0  ;;  %v481_v58 = vadd.f32 %v473_v50, %v456_v41  ;;  %v498_v59 = vmul.f32 0.125, %v490_v31  ;;  %v474_v60 = vmul.f32 0.375, %v466_v47  ;;  %v433_v61 = vmul.f32 0.125, %v466_v47  ;;  %v492_v62 = vld [vmem:[#allocation3 + $0x48] sm:$0xff] }
  0x51   :  { %419 = vst.msk [vmem:[#allocation3 + $0x78] sm:$0xff] %vm13_vm0, %v401_v53  ;;  %v402_v63 = vadd.f32 %v384_v48, %v330_v54  ;;  %v331_v0 = vadd.f32 %v313_v45, %v259_v55  ;;  %v457_v1 = vadd.f32 %v449_v56, %v432_v51  ;;  %v450_v2 = vmul.f32 0.375, %v491_v52  ;;  %v468_v3 = vld [vmem:[#allocation3 + $0x50] sm:$0xff]  ;;  %v493_v4 = vld [vmem:[#allocation3 + $0x58] sm:$0xff]  ;;  %v469_v13 = vld [vmem:[#allocation3 + $0x60] sm:$0xff]  ;;  %s566_s0 = smov [#allocation4]  }
  0x52   :  { %v506_v5 = vadd.f32 %v498_v59, %v481_v58  ;;  %v499_v6 = vmul.f32 0.125, %v491_v52  ;;  %v475_v7 = vmul.f32 0.375, %v467_v57  ;;  %v434_v8 = vmul.f32 0.125, %v467_v57  ;;  %s526_s12 = sshll.u32 %s566_s0, 4  ;;  %s527_s12 = int_to_ptr.vmem [resolvable:$true] %s526_s12 }
  0x53   :  { %420 = vst.msk [vmem:[#allocation3 + $0x80] sm:$0xff] %vm13_vm0, %v402_v63  ;;  %v403_v9 = vadd.f32 %v385_v49, %v331_v0  ;;  %v482_v10 = vadd.f32 %v474_v60, %v457_v1  ;;  %v458_v11 = vadd.f32 %v450_v2, %v433_v61  ;;  %v451_v12 = vmul.f32 0.375, %v492_v62  ;;  %v494_v14 = vld [vmem:[#allocation3 + $0x68] sm:$0xff]  ;;  %s541_s13 = scalar_lea.vmem %s527_s12, 1024  ;;  %p546_p1 = scmp.lt.s32.totalorder %s527_s12, %s527_s12 }
  0x54   :  { %514 = vst.msk [vmem:[#allocation4 + $0x8] sm:$0xff] %vm13_vm0, %v506_v5  ;;  %v500_v15 = vmul.f32 0.125, %v492_v62  ;;  %v435_v16 = vmul.f32 0.125, %v468_v3  ;;  %v452_v17 = vmul.f32 0.375, %v493_v4  ;;  %v476_v22 = vmul.f32 0.375, %v468_v3  ;;  %p542_p0 = scmp.ne.s32.totalorder %s527_s12, %s541_s13  ;;  %p547_p2 = scmp.lt.s32.totalorder %s541_s13, %s541_s13 }
  0x55   :  { %421 = vst.msk [vmem:[#allocation3 + $0x88] sm:$0xff] %vm13_vm0, %v403_v9  ;;  %v507_v18 = vadd.f32 %v499_v6, %v482_v10  ;;  %v483_v20 = vadd.f32 %v475_v7, %v458_v11  ;;  %v459_v21 = vadd.f32 %v451_v12, %v434_v8  ;;  %v470_v23 = vld [vmem:[#allocation3 + $0x70] sm:$0xff]  ;;  %v477_v25 = vmul.f32 0.375, %v469_v13 }
  0x56   :  { %v460_v24 = vadd.f32 %v452_v17, %v435_v16  ;;  %v436_v26 = vmul.f32 0.125, %v469_v13  ;;  %v453_v27 = vmul.f32 0.375, %v494_v14  ;;  %v501_v30 = vmul.f32 0.125, %v493_v4  ;;  %p548_p3 = por %p547_p2, %p546_p1 }
  0x57   :  { %515 = vst.msk [vmem:[#allocation4 + $0x10] sm:$0xff] %vm13_vm0, %v507_v18  ;;  %v508_v28 = vadd.f32 %v500_v15, %v483_v20  ;;  %v484_v29 = vadd.f32 %v476_v22, %v459_v21  ;;  %v437_v31 = vmul.f32 0.125, %v470_v23  ;;  %v502_v33 = vmul.f32 0.125, %v494_v14 }
  0x58   :  { %v485_v32 = vadd.f32 %v477_v25, %v460_v24  ;;  %v461_v34 = vadd.f32 %v453_v27, %v436_v26  ;;  %v478_v35 = vmul.f32 0.375, %v470_v23  ;;  %v495_v36 = vld [vmem:[#allocation3 + $0x78] sm:$0xff]  ;;  %p549_p4 = pnand %p548_p3, %p542_p0 }
  0x59   :  { %516 = vst.msk [vmem:[#allocation4 + $0x18] sm:$0xff] %vm13_vm0, %v508_v28  ;;  %v509_v37 = vadd.f32 %v501_v30, %v484_v29  ;;  %v454_v38 = vmul.f32 0.375, %v495_v36  ;;  %v503_v40 = vmul.f32 0.125, %v495_v36 }
  0x5a   :  { %v510_v19 = vadd.f32 %v502_v33, %v485_v32  ;;  %v486_v39 = vadd.f32 %v478_v35, %v461_v34  ;;  %v471_v41 = vld [vmem:[#allocation3 + $0x80] sm:$0xff] }
  0x5b   :  { %517 = vst.msk [vmem:[#allocation4 + $0x20] sm:$0xff] %vm13_vm0, %v509_v37  ;;  %v462_v42 = vadd.f32 %v454_v38, %v437_v31  ;;  %v479_v43 = vmul.f32 0.375, %v471_v41 }
  0x5c   :  { %518 = vst.msk [vmem:[#allocation4 + $0x28] sm:$0xff] %vm13_vm0, %v510_v19  ;;  %v511_v44 = vadd.f32 %v503_v40, %v486_v39  ;;  %v496_v45 = vld [vmem:[#allocation3 + $0x88] sm:$0xff] }
  0x5d   :  { %v487_v46 = vadd.f32 %v479_v43, %v462_v42  ;;  %v504_v47 = vmul.f32 0.125, %v496_v45 }
  0x5e   :  { %519 = vst.msk [vmem:[#allocation4 + $0x30] sm:$0xff] %vm13_vm0, %v511_v44 }
  0x5f   :  { %v512_v48 = vadd.f32 %v504_v47, %v487_v46 }
  0x61   :  { %520 = vst.msk [vmem:[#allocation4 + $0x38] sm:$0xff] %vm13_vm0, %v512_v48 }
  0x62   :  { %552 = shalt.err (!%p549_p4)
}
  0x63   :  { %s553_s16 = scalar_lea.hbm %s804_s1, 1024 }
  0x64   :  { %p554_p5 = scmp.ne.s32.totalorder %s804_s1, %s553_s16  ;;  %p557_p6 = scmp.lt.u32.totalorder %s553_s16, %s804_s1 }
  0x66   :  { %p559_p7 = pnand %p557_p6, %p554_p5 }
  0x68   :  { %562 = shalt.err (!%p559_p7)
}
  0x69   :  { %s567_s21 = smov 128   ;;  %s568_s22 = smov 8  }
  0x6a   :  { %532 = dma.vmem_to_hbm [thread:$0]  %s527_s12, 1024, %s804_s1, [#allocation5], %s567_s21, %s567_s21, %s568_s22  }
  0x6b   :  { %563 = dma.done.wait [#allocation5], 1024  }
  0x6c   :  { %564 = vsyncadd [#allocation5], 4294966272 }
  0x6d   :  { %536 = vsyncpa [#allocation5], 1 }

</bundles_post_ra>
